<compile_context>
chip_gen: v7x
topology: tpu7x:2x2x1
jax: 0.10.0
libtpu: 0.0.40
codegen_flags: <defaults>
</compile_context>

<pallas_src>
import functools

import jax
import jax.numpy as jnp
from jax.experimental import pallas as pl
from jax.experimental.pallas import tpu as pltpu


def _round_up(x, m):
    return (x + m - 1) // m * m


# ----------------------------------------------------------------------------
# Kernel: fully fused 3-layer MLP. Weights arrive as bf16 (in, out) tiles,
# biases as f32 (1, out); all three matmuls run bf16 x bf16 -> f32 on the MXU.
# ----------------------------------------------------------------------------
def actor_kernel(x_ref, w1_ref, b1_ref, w2_ref, b2_ref, w3_ref, b3_ref,
                 o_ref, *, max_action):
    # Layer 1: relu(x @ W1 + b1)
    x = x_ref[...].astype(jnp.bfloat16)
    h1 = jnp.dot(x, w1_ref[...], preferred_element_type=jnp.float32)
    h1 = jnp.maximum(h1 + b1_ref[...], 0.0)
    # Layer 2: relu(h1 @ W2 + b2)
    h2 = jnp.dot(h1.astype(jnp.bfloat16), w2_ref[...],
                 preferred_element_type=jnp.float32)
    h2 = jnp.maximum(h2 + b2_ref[...], 0.0)
    # Layer 3: max_action * tanh(h2 @ W3 + b3)
    h3 = jnp.dot(h2.astype(jnp.bfloat16), w3_ref[...],
                 preferred_element_type=jnp.float32)
    o_ref[...] = (max_action * jnp.tanh(h3 + b3_ref[...])).astype(o_ref.dtype)


# ----------------------------------------------------------------------------
# One-time parameter preparation: pad feature dims up to multiples of 128 and
# cast weights to bf16.  Done at init / after each optimizer step, NOT per call.
# ----------------------------------------------------------------------------
def prepare_actor_params(params):
    w1, b1 = params["w1"], params["b1"]
    w2, b2 = params["w2"], params["b2"]
    w3, b3 = params["w3"], params["b3"]

    S, H1 = w1.shape
    H2 = w2.shape[1]
    A = w3.shape[1]
    Sp, H1p, H2p, Ap = (_round_up(d, 128) for d in (S, H1, H2, A))

    return {
        "w1": jnp.zeros((Sp, H1p), jnp.bfloat16).at[:S, :H1].set(
            w1.astype(jnp.bfloat16)),
        "b1": jnp.zeros((1, H1p), jnp.float32).at[0, :H1].set(b1),
        "w2": jnp.zeros((H1p, H2p), jnp.bfloat16).at[:H1, :H2].set(
            w2.astype(jnp.bfloat16)),
        "b2": jnp.zeros((1, H2p), jnp.float32).at[0, :H2].set(b2),
        "w3": jnp.zeros((H2p, Ap), jnp.bfloat16).at[:H2, :A].set(
            w3.astype(jnp.bfloat16)),
        "b3": jnp.zeros((1, Ap), jnp.float32).at[0, :A].set(b3),
    }


# ----------------------------------------------------------------------------
# Jitted forward: pad x (fused with the pallas_call under one jit), run the
# fused kernel gridless (whole arrays resident in VMEM), slice off padding.
# `prepared` is a dict of already-padded device arrays, so parameter updates
# do not trigger recompilation.
# ----------------------------------------------------------------------------
@functools.partial(jax.jit, static_argnames=("max_action", "action_dim"))
def actor_forward(x, prepared, *, max_action, action_dim):
    B, S = x.shape
    Sp = prepared["w1"].shape[0]
    Ap = prepared["w3"].shape[1]
    Bp = _round_up(max(B, 8), 8)

    xp = jnp.zeros((Bp, Sp), jnp.float32).at[:B, :S].set(x)

    kernel = functools.partial(actor_kernel, max_action=float(max_action))

    # Gridless call: no grid -> no per-step overhead, no double-buffering;
    # every operand is a single whole-array block living in VMEM.
    # TODO(synk): for large batches on v7x, add a batch grid axis with
    # dimension_semantics=("parallel",) so both TensorCores share the work.
    out_p = pl.pallas_call(
        kernel,
        out_shape=jax.ShapeDtypeStruct((Bp, Ap), jnp.float32),
        in_specs=[pl.BlockSpec(memory_space=pltpu.MemorySpace.VMEM)] * 7,
        out_specs=pl.BlockSpec(memory_space=pltpu.MemorySpace.VMEM),
    )(xp, prepared["w1"], prepared["b1"], prepared["w2"], prepared["b2"],
      prepared["w3"], prepared["b3"])

    return out_p[:B, :action_dim]


def init_actor_params(key, state_dim, action_dim):
    """Deterministic init mimicking PyTorch nn.Linear default U(-1/sqrt(fan_in), +)."""
    ks = jax.random.split(key, 6)

    def linear(kw, kb, fan_in, fan_out):
        bound = 1.0 / jnp.sqrt(fan_in)
        w = jax.random.uniform(kw, (fan_in, fan_out), jnp.float32, -bound, bound)
        b = jax.random.uniform(kb, (fan_out,), jnp.float32, -bound, bound)
        return w, b

    w1, b1 = linear(ks[0], ks[1], state_dim, 400)
    w2, b2 = linear(ks[2], ks[3], 400, 300)
    w3, b3 = linear(ks[4], ks[5], 300, action_dim)
    return {"w1": w1, "b1": b1, "w2": w2, "b2": b2, "w3": w3, "b3": b3}


if __name__ == "__main__":
    key = jax.random.PRNGKey(0)
    k_params, k_x = jax.random.split(key)

    batch = 2
    state_dim = 16
    action_dim = 4
    max_action = 2.0

    params = init_actor_params(k_params, state_dim, action_dim)
    prepared = prepare_actor_params(params)   # one-time padding + bf16 cast
    x = jax.random.normal(k_x, (batch, state_dim), jnp.float32)

    out = actor_forward(x, prepared, max_action=max_action,
                        action_dim=action_dim)
    out = jax.block_until_ready(out)

    # Pure-JAX reference using the same bf16-rounded weights (f32 math).
    w1q = params["w1"].astype(jnp.bfloat16).astype(jnp.float32)
    w2q = params["w2"].astype(jnp.bfloat16).astype(jnp.float32)
    w3q = params["w3"].astype(jnp.bfloat16).astype(jnp.float32)
    h = jnp.maximum(x @ w1q + params["b1"], 0.0)
    h = jnp.maximum(h @ w2q + params["b2"], 0.0)
    ref = max_action * jnp.tanh(h @ w3q + params["b3"])

    assert out.shape == (batch, action_dim)
    # bf16 activations inside the kernel vs f32 reference -> loosened tolerance.
    assert jnp.allclose(out, ref, atol=5e-2, rtol=5e-2), (out, ref)

    print("KERNEL_OK")
</pallas_src>

<mosaic_0001>
module attributes {stable_mosaic.version = 11 : i64} {
  func.func @actor_kernel(%arg0: memref<8x128xf32, #tpu.memory_space<vmem>>, %arg1: memref<128x512xbf16, #tpu.memory_space<vmem>>, %arg2: memref<1x512xf32, #tpu.memory_space<vmem>>, %arg3: memref<512x384xbf16, #tpu.memory_space<vmem>>, %arg4: memref<1x384xf32, #tpu.memory_space<vmem>>, %arg5: memref<384x128xbf16, #tpu.memory_space<vmem>>, %arg6: memref<1x128xf32, #tpu.memory_space<vmem>>, %arg7: memref<8x128xf32, #tpu.memory_space<vmem>>) attributes {dimension_semantics = [], scalar_prefetch = 0 : i64, scratch_operands = 0 : i64, tpu.core_type = #tpu.core_type<tc>} {
    %c0 = arith.constant 0 : index
    %c0_0 = arith.constant 0 : index
    %0 = vector.load %arg0[%c0, %c0_0] : memref<8x128xf32, #tpu.memory_space<vmem>>, vector<8x128xf32>
    %1 = arith.truncf %0 : vector<8x128xf32> to vector<8x128xbf16>
    %c0_1 = arith.constant 0 : index
    %c0_2 = arith.constant 0 : index
    %2 = vector.load %arg1[%c0_1, %c0_2] : memref<128x512xbf16, #tpu.memory_space<vmem>>, vector<128x512xbf16>
    %cst = arith.constant dense<0.000000e+00> : vector<8x512xf32>
    %3 = tpu.matmul %1, %2, %cst {dimension_numbers = #tpu.dot_dimension_numbers<[1], [0], [0], [1], [0, 0, 1, 1], [], []>} : vector<8x128xbf16>, vector<128x512xbf16>, vector<8x512xf32> -> vector<8x512xf32>
    %c0_3 = arith.constant 0 : index
    %c0_4 = arith.constant 0 : index
    %4 = vector.load %arg2[%c0_3, %c0_4] : memref<1x512xf32, #tpu.memory_space<vmem>>, vector<1x512xf32>
    %5 = vector.broadcast %4 : vector<1x512xf32> to vector<8x512xf32>
    %6 = arith.addf %3, %5 : vector<8x512xf32>
    %cst_5 = arith.constant 0.000000e+00 : f32
    %7 = vector.broadcast %cst_5 : f32 to vector<8x512xf32>
    %8 = arith.maximumf %6, %7 : vector<8x512xf32>
    %9 = arith.truncf %8 : vector<8x512xf32> to vector<8x512xbf16>
    %c0_6 = arith.constant 0 : index
    %c0_7 = arith.constant 0 : index
    %10 = vector.load %arg3[%c0_6, %c0_7] : memref<512x384xbf16, #tpu.memory_space<vmem>>, vector<512x384xbf16>
    %cst_8 = arith.constant dense<0.000000e+00> : vector<8x384xf32>
    %11 = tpu.matmul %9, %10, %cst_8 {dimension_numbers = #tpu.dot_dimension_numbers<[1], [0], [0], [1], [0, 0, 1, 1], [], []>} : vector<8x512xbf16>, vector<512x384xbf16>, vector<8x384xf32> -> vector<8x384xf32>
    %c0_9 = arith.constant 0 : index
    %c0_10 = arith.constant 0 : index
    %12 = vector.load %arg4[%c0_9, %c0_10] : memref<1x384xf32, #tpu.memory_space<vmem>>, vector<1x384xf32>
    %13 = vector.broadcast %12 : vector<1x384xf32> to vector<8x384xf32>
    %14 = arith.addf %11, %13 : vector<8x384xf32>
    %cst_11 = arith.constant 0.000000e+00 : f32
    %15 = vector.broadcast %cst_11 : f32 to vector<8x384xf32>
    %16 = arith.maximumf %14, %15 : vector<8x384xf32>
    %17 = arith.truncf %16 : vector<8x384xf32> to vector<8x384xbf16>
    %c0_12 = arith.constant 0 : index
    %c0_13 = arith.constant 0 : index
    %18 = vector.load %arg5[%c0_12, %c0_13] : memref<384x128xbf16, #tpu.memory_space<vmem>>, vector<384x128xbf16>
    %cst_14 = arith.constant dense<0.000000e+00> : vector<8x128xf32>
    %19 = tpu.matmul %17, %18, %cst_14 {dimension_numbers = #tpu.dot_dimension_numbers<[1], [0], [0], [1], [0, 0, 1, 1], [], []>} : vector<8x384xbf16>, vector<384x128xbf16>, vector<8x128xf32> -> vector<8x128xf32>
    %c0_15 = arith.constant 0 : index
    %c0_16 = arith.constant 0 : index
    %20 = vector.load %arg6[%c0_15, %c0_16] : memref<1x128xf32, #tpu.memory_space<vmem>>, vector<1x128xf32>
    %21 = vector.broadcast %20 : vector<1x128xf32> to vector<8x128xf32>
    %22 = arith.addf %19, %21 : vector<8x128xf32>
    %23 = math.tanh %22 : vector<8x128xf32>
    %cst_17 = arith.constant 2.000000e+00 : f32
    %24 = vector.broadcast %cst_17 : f32 to vector<8x128xf32>
    %25 = arith.mulf %24, %23 : vector<8x128xf32>
    %c0_18 = arith.constant 0 : index
    %c0_19 = arith.constant 0 : index
    %26 = vector.load %arg7[%c0_18, %c0_19] : memref<8x128xf32, #tpu.memory_space<vmem>>, vector<8x128xf32>
    tpu.vector_store %arg7[%c0_18, %c0_19], %25 {strides = array<i32>} : memref<8x128xf32, #tpu.memory_space<vmem>>, vector<8x128xf32>,
    return
  }
}

</mosaic_0001>

<bundles_post_ra>
// kernel: actor_forward.1
= control target key start
LH: loop header
LB: loop body
LE: loop exit
PB: predicated region body
PF: predicated region fallthrough
CT: control target
= control target key end

     0   :  { %12 = vsyncpa [#allocation3], 0  ;;  %s2152_s0 = inlined_call_operand.vmem [shape: f32[8,128], index: 0, kind: input, shape index: {}]   ;;  %s2153_s1 = inlined_call_operand.hbm [shape: bf16[128,512], index: 1, kind: input, shape index: {}]   ;;  %s2154_s2 = inlined_call_operand.vmem [shape: f32[1,512], index: 2, kind: input, shape index: {}]   ;;  %s2155_s3 = inlined_call_operand.hbm [shape: bf16[512,384], index: 3, kind: input, shape index: {}]   ;;  %s2156_s4 = inlined_call_operand.vmem [shape: f32[1,384], index: 4, kind: input, shape index: {}]   ;;  %s2157_s5 = inlined_call_operand.hbm [shape: bf16[384,128], index: 5, kind: input, shape index: {}]   ;;  %s2158_s6 = inlined_call_operand.vmem [shape: f32[1,128], index: 6, kind: input, shape index: {}]   ;;  %s2159_s7 = inlined_call_operand.vmem [shape: f32[8,128], index: 7, kind: output, shape index: {}]  }
   0x1   :  { %13 = vsyncpa [#allocation5], 0  ;;  %s2025_s24 = smov [#allocation4]   ;;  %s1955_s28 = scalar_lea.hbm %s2155_s3, 12288 }
   0x2   :  { %s35_s25 = sshll.u32 %s2025_s24, 4  ;;  %p1956_p0 = scmp.ne.s32.totalorder %s2155_s3, %s1955_s28  ;;  %s36_s25 = int_to_ptr.vmem [resolvable:$true] %s35_s25 }
   0x3   :  { %p1959_p1 = scmp.lt.u32.totalorder %s1955_s28, %s2155_s3 }
   0x5   :  { %p1961_p2 = pnand %p1959_p1, %p1956_p0 }
   0x7   :  { %1964 = shalt.err (!%p1961_p2)
}
   0x8   :  { %s1965_s10 = scalar_lea.vmem %s36_s25, 12288  ;;  %p1970_p4 = scmp.lt.s32.totalorder %s36_s25, %s36_s25 }
   0x9   :  { %p1966_p3 = scmp.ne.s32.totalorder %s36_s25, %s1965_s10  ;;  %p1971_p5 = scmp.lt.s32.totalorder %s1965_s10, %s1965_s10 }
   0xb   :  { %p1972_p6 = por %p1971_p5, %p1970_p4 }
   0xd   :  { %p1973_p7 = pnand %p1972_p6, %p1966_p3 }
   0xf   :  { %1976 = shalt.err (!%p1973_p7)
}
  0x10   :  { %s2026_s11 = smov 192   ;;  %s2027_s12 = smov 12  }
  0x11   :  { %41 = dma.hbm_to_vmem [thread:$0]  %s2155_s3, 12288, %s36_s25, [#allocation5], %s2026_s11, %s2026_s11, %s2027_s12  }
  0x12   :  { %s2028_s15 = smov [#allocation2]   ;;  %s1977_s19 = scalar_lea.hbm %s2153_s1, 4096 }
  0x13   :  { %s21_s16 = sshll.u32 %s2028_s15, 4  ;;  %p1978_p8 = scmp.ne.s32.totalorder %s2153_s1, %s1977_s19  ;;  %s22_s16 = int_to_ptr.vmem [resolvable:$true] %s21_s16 }
  0x14   :  { %p1981_p9 = scmp.lt.u32.totalorder %s1977_s19, %s2153_s1 }
  0x16   :  { %p1983_p10 = pnand %p1981_p9, %p1978_p8 }
  0x18   :  { %1986 = shalt.err (!%p1983_p10)
}
  0x19   :  { %s1987_s24 = scalar_lea.vmem %s22_s16, 4096  ;;  %p1992_p12 = scmp.lt.s32.totalorder %s22_s16, %s22_s16 }
  0x1a   :  { %p1988_p11 = scmp.ne.s32.totalorder %s22_s16, %s1987_s24  ;;  %p1993_p13 = scmp.lt.s32.totalorder %s1987_s24, %s1987_s24 }
  0x1c   :  { %p1994_p0 = por %p1993_p13, %p1992_p12 }
  0x1e   :  { %p1995_p1 = pnand %p1994_p0, %p1988_p11 }
  0x20   :  { %1998 = shalt.err (!%p1995_p1)
}
  0x21   :  { %s2029_s3 = smov 256   ;;  %s2030_s25 = smov 16  }
  0x22   :  { %27 = dma.hbm_to_vmem [thread:$0]  %s2153_s1, 4096, %s22_s16, [#allocation3], %s2029_s3, %s2029_s3, %s2030_s25  }
  0x23   :  { %s2031_s28 = smov [#allocation6]   ;;  %s1999_s9 = scalar_lea.hbm %s2157_s5, 3072 }
  0x24   :  { %s49_s29 = sshll.u32 %s2031_s28, 4  ;;  %p2000_p2 = scmp.ne.s32.totalorder %s2157_s5, %s1999_s9  ;;  %s50_s29 = int_to_ptr.vmem [resolvable:$true] %s49_s29 }
  0x25   :  { %p2003_p3 = scmp.lt.u32.totalorder %s1999_s9, %s2157_s5 }
  0x27   :  { %p2005_p4 = pnand %p2003_p3, %p2000_p2 }
  0x29   :  { %2008 = shalt.err (!%p2005_p4)
}
  0x2a   :  { %s2009_s14 = scalar_lea.vmem %s50_s29, 3072  ;;  %p2014_p6 = scmp.lt.s32.totalorder %s50_s29, %s50_s29 }
  0x2b   :  { %p2010_p5 = scmp.ne.s32.totalorder %s50_s29, %s2009_s14  ;;  %p2015_p7 = scmp.lt.s32.totalorder %s2009_s14, %s2009_s14 }
  0x2d   :  { %p2016_p8 = por %p2015_p7, %p2014_p6 }
  0x2f   :  { %p2017_p9 = pnand %p2016_p8, %p2010_p5 }
  0x31   :  { %2020 = shalt.err (!%p2017_p9)
}
  0x32   :  { %s2032_s1 = smov 64   ;;  %s2033_s15 = smov 4  }
  0x33   :  { %55 = dma.hbm_to_vmem [thread:$0]  %s2157_s5, 3072, %s50_s29, [#allocation5], %s2032_s1, %s2032_s1, %s2033_s15  }
  0x34   :  { %2021 = dma.done.wait [#allocation3], 4096  }
  0x35   :  { %2022 = vsyncadd [#allocation3], 4294963200 }
  0x36   :  { %2023 = dma.done.wait [#allocation5], 15360  }
  0x37   :  { %2024 = vsyncadd [#allocation5], 4294951936  ;;  %v2034_v0 = vmov 0   ;;  %v1753_v1 = vld [vmem:[#allocation2 + $0x4] ss:$16 sps:$4 sm:$0xff]   ;;  %vm2036_vm0 = vmmov 0  }
  0x38   :  { %316 = vmatprep.mubr.bf16.mxu0 %v2034_v0  ;;  %357 = vmatprep.mubr.bf16.mxu1 %v2034_v0  ;;  %v1755_v2 = vld [vmem:[#allocation2] ss:$16 sps:$4 sm:$0xff]   ;;  %v1756_v3 = vld [vmem:[#allocation2 + $0x24] ss:$16 sps:$4 sm:$0xff]   ;;  %v1777_v10 = vld [vmem:[#allocation2 + $0xc] ss:$16 sps:$4 sm:$0xff]  }
  0x39   :  { %284 = vmatprep.subr.bf16.mxu0 %v1753_v1  ;;  %v1758_v4 = vld [vmem:[#allocation2 + $0x20] ss:$16 sps:$4 sm:$0xff]   ;;  %v1759_v5 = vld [vmem:[#allocation2 + $0x44] ss:$16 sps:$4 sm:$0xff]   ;;  %v1779_v11 = vld [vmem:[#allocation2 + $0x8] ss:$16 sps:$4 sm:$0xff]   ;;  %325 = vmatprep.subr.bf16.mxu1 %v1777_v10 }
  0x3a   :  { %285 = vmatpush1.bf16.msra.mxu0 %v1755_v2  ;;  %v1761_v6 = vld [vmem:[#allocation2 + $0x40] ss:$16 sps:$4 sm:$0xff]   ;;  %v1762_v7 = vld [vmem:[#allocation2 + $0x64] ss:$16 sps:$4 sm:$0xff]   ;;  %v1780_v12 = vld [vmem:[#allocation2 + $0x2c] ss:$16 sps:$4 sm:$0xff]   ;;  %326 = vmatpush1.bf16.msra.mxu1 %v1779_v11 }
  0x3b   :  { %286 = vmatprep.subr.bf16.mxu0 %v1756_v3  ;;  %v1764_v8 = vld [vmem:[#allocation2 + $0x60] ss:$16 sps:$4 sm:$0xff]   ;;  %v1765_v9 = vld [vmem:[#allocation2 + $0x84] ss:$16 sps:$4 sm:$0xff]   ;;  %v1782_v14 = vld [vmem:[#allocation2 + $0x28] ss:$16 sps:$4 sm:$0xff]   ;;  %327 = vmatprep.subr.bf16.mxu1 %v1780_v12 }
  0x3c   :  { %v1767_v13 = vld [vmem:[#allocation2 + $0x80] ss:$16 sps:$4 sm:$0xff]   ;;  %v1783_v15 = vld [vmem:[#allocation2 + $0x4c] ss:$16 sps:$4 sm:$0xff]   ;;  %v1768_v16 = vld [vmem:[#allocation2 + $0xa4] ss:$16 sps:$4 sm:$0xff]  }
  0x3d   :  { %v1770_v17 = vld [vmem:[#allocation2 + $0xa0] ss:$16 sps:$4 sm:$0xff]   ;;  %v1785_v18 = vld [vmem:[#allocation2 + $0x48] ss:$16 sps:$4 sm:$0xff]   ;;  %v1786_v19 = vld [vmem:[#allocation2 + $0x6c] ss:$16 sps:$4 sm:$0xff]  }
  0x3e   :  { %287 = vmatpush1.bf16.msra.mxu0 %v1758_v4  ;;  %328 = vmatpush1.bf16.msra.mxu1 %v1782_v14  ;;  %v1771_v20 = vld [vmem:[#allocation2 + $0xc4] ss:$16 sps:$4 sm:$0xff]   ;;  %v1773_v21 = vld [vmem:[#allocation2 + $0xc0] ss:$16 sps:$4 sm:$0xff]   ;;  %v1788_v22 = vld [vmem:[#allocation2 + $0x68] ss:$16 sps:$4 sm:$0xff]  }
  0x3f   :  { %288 = vmatprep.subr.bf16.mxu0 %v1759_v5  ;;  %329 = vmatprep.subr.bf16.mxu1 %v1783_v15  ;;  %v1789_v23 = vld [vmem:[#allocation2 + $0x8c] ss:$16 sps:$4 sm:$0xff]   ;;  %v1774_v24 = vld [vmem:[#allocation2 + $0xe4] ss:$16 sps:$4 sm:$0xff]   ;;  %v1776_v25 = vld [vmem:[#allocation2 + $0xe0] ss:$16 sps:$4 sm:$0xff]  }
  0x40   :  { %v68_v26 = vld [vmem:[%s2152_s0] sm:$0xff]  ;;  %v1791_v27 = vld [vmem:[#allocation2 + $0x88] ss:$16 sps:$4 sm:$0xff]   ;;  %v1792_v28 = vld [vmem:[#allocation2 + $0xac] ss:$16 sps:$4 sm:$0xff]  }
  0x41   :  { %v1803_v29 = vld [vmem:[#allocation4 + $0x4] ss:$12 sps:$4 sm:$0xff]   ;;  %v69_v30 = vpack.c.bf16 %v68_v26, %v68_v26  ;;  %v1794_v31 = vld [vmem:[#allocation2 + $0xa8] ss:$16 sps:$4 sm:$0xff]   ;;  %v1795_v32 = vld [vmem:[#allocation2 + $0xcc] ss:$16 sps:$4 sm:$0xff]  }
  0x42   :  { %289 = vmatpush1.bf16.msra.mxu0 %v1761_v6  ;;  %330 = vmatpush1.bf16.msra.mxu1 %v1785_v18  ;;  %v1801_v33 = vld [vmem:[#allocation4] ss:$12 sps:$4 sm:$0xff]   ;;  %v1806_v34 = vld [vmem:[#allocation4 + $0x1c] ss:$12 sps:$4 sm:$0xff]   ;;  %v1804_v37 = vld [vmem:[#allocation4 + $0x18] ss:$12 sps:$4 sm:$0xff]  }
  0x43   :  { %290 = vmatprep.subr.bf16.mxu0 %v1762_v7  ;;  %331 = vmatprep.subr.bf16.mxu1 %v1786_v19  ;;  %v1797_v35 = vld [vmem:[#allocation2 + $0xc8] ss:$16 sps:$4 sm:$0xff]   ;;  %v1798_v36 = vld [vmem:[#allocation2 + $0xec] ss:$16 sps:$4 sm:$0xff]   ;;  %v1809_v38 = vld [vmem:[#allocation4 + $0x34] ss:$12 sps:$4 sm:$0xff]  }
  0x44   :  { %v1800_v39 = vld [vmem:[#allocation2 + $0xe8] ss:$16 sps:$4 sm:$0xff]   ;;  %v1807_v40 = vld [vmem:[#allocation4 + $0x30] ss:$12 sps:$4 sm:$0xff]   ;;  %v1833_v45 = vld [vmem:[#allocation4 + $0xe0] ss:$12 sps:$4 sm:$0xff]  }
  0x45   :  { %v1828_v41 = vld [vmem:[#allocation4 + $0xc8] ss:$12 sps:$4 sm:$0xff]   ;;  %v1812_v42 = vld [vmem:[#allocation4 + $0x4c] ss:$12 sps:$4 sm:$0xff]   ;;  %v1815_v46 = vld [vmem:[#allocation4 + $0x64] ss:$12 sps:$4 sm:$0xff]  }
  0x46   :  { %291 = vmatpush1.bf16.msra.mxu0 %v1764_v8  ;;  %332 = vmatpush1.bf16.msra.mxu1 %v1788_v22  ;;  %v1829_v43 = vld [vmem:[#allocation4 + $0x8] ss:$12 sps:$4 sm:$0xff]   ;;  %v1813_v47 = vld [vmem:[#allocation4 + $0x60] ss:$12 sps:$4 sm:$0xff]   ;;  %v1838_v49 = vld [vmem:[#allocation4 + $0xf8] ss:$12 sps:$4 sm:$0xff]  }
  0x47   :  { %292 = vmatprep.subr.bf16.mxu0 %v1765_v9  ;;  %333 = vmatprep.subr.bf16.mxu1 %v1789_v23  ;;  %v1810_v44 = vld [vmem:[#allocation4 + $0x48] ss:$12 sps:$4 sm:$0xff]   ;;  %v1834_v48 = vld [vmem:[#allocation4 + $0x20] ss:$12 sps:$4 sm:$0xff]   ;;  %v1816_v51 = vld [vmem:[#allocation4 + $0x78] ss:$12 sps:$4 sm:$0xff]  }
  0x48   :  { %v1818_v50 = vld [vmem:[#allocation4 + $0x7c] ss:$12 sps:$4 sm:$0xff]   ;;  %v1839_v52 = vld [vmem:[#allocation4 + $0x38] ss:$12 sps:$4 sm:$0xff]   ;;  %v1821_v54 = vld [vmem:[#allocation4 + $0x94] ss:$12 sps:$4 sm:$0xff]  }
  0x49   :  { %v1843_v53 = vld [vmem:[#allocation4 + $0x110] ss:$12 sps:$4 sm:$0xff]   ;;  %v1848_v57 = vld [vmem:[#allocation4 + $0x128] ss:$12 sps:$4 sm:$0xff]   ;;  %v1824_v58 = vld [vmem:[#allocation4 + $0xac] ss:$12 sps:$4 sm:$0xff]  }
  0x4a   :  { %293 = vmatpush1.bf16.msra.mxu0 %v1767_v13  ;;  %334 = vmatpush1.bf16.msra.mxu1 %v1791_v27  ;;  %v1844_v55 = vld [vmem:[#allocation4 + $0x50] ss:$12 sps:$4 sm:$0xff]   ;;  %v1849_v59 = vld [vmem:[#allocation4 + $0x68] ss:$12 sps:$4 sm:$0xff]   ;;  %v1853_v61 = vld [vmem:[#allocation4 + $0x140] ss:$12 sps:$4 sm:$0xff]  }
  0x4b   :  { %294 = vmatprep.subr.bf16.mxu0 %v1768_v16  ;;  %335 = vmatprep.subr.bf16.mxu1 %v1792_v28  ;;  %v1819_v56 = vld [vmem:[#allocation4 + $0x90] ss:$12 sps:$4 sm:$0xff]   ;;  %v1822_v60 = vld [vmem:[#allocation4 + $0xa8] ss:$12 sps:$4 sm:$0xff]   ;;  %v1854_v63 = vld [vmem:[#allocation4 + $0x80] ss:$12 sps:$4 sm:$0xff]  }
  0x4c   :  { %v1827_v62 = vld [vmem:[#allocation4 + $0xc4] ss:$12 sps:$4 sm:$0xff]   ;;  %v1825_v0 = vld [vmem:[#allocation4 + $0xc0] ss:$12 sps:$4 sm:$0xff]   ;;  %v1832_v1 = vld [vmem:[#allocation4 + $0xdc] ss:$12 sps:$4 sm:$0xff]  }
  0x4d   :  { %v1830_v2 = vld [vmem:[#allocation4 + $0xd8] ss:$12 sps:$4 sm:$0xff]   ;;  %v1837_v3 = vld [vmem:[#allocation4 + $0xf4] ss:$12 sps:$4 sm:$0xff]   ;;  %v1835_v4 = vld [vmem:[#allocation4 + $0xf0] ss:$12 sps:$4 sm:$0xff]  }
  0x4e   :  { %295 = vmatpush1.bf16.msra.mxu0 %v1770_v17  ;;  %336 = vmatpush1.bf16.msra.mxu1 %v1794_v31  ;;  %v1842_v5 = vld [vmem:[#allocation4 + $0x10c] ss:$12 sps:$4 sm:$0xff]   ;;  %v1840_v6 = vld [vmem:[#allocation4 + $0x108] ss:$12 sps:$4 sm:$0xff]   ;;  %v1847_v7 = vld [vmem:[#allocation4 + $0x124] ss:$12 sps:$4 sm:$0xff]  }
  0x4f   :  { %296 = vmatprep.subr.bf16.mxu0 %v1771_v20  ;;  %337 = vmatprep.subr.bf16.mxu1 %v1795_v32  ;;  %v1845_v8 = vld [vmem:[#allocation4 + $0x120] ss:$12 sps:$4 sm:$0xff]   ;;  %v1852_v9 = vld [vmem:[#allocation4 + $0x13c] ss:$12 sps:$4 sm:$0xff]   ;;  %v1850_v10 = vld [vmem:[#allocation4 + $0x138] ss:$12 sps:$4 sm:$0xff]  }
  0x50   :  { %v1857_v11 = vld [vmem:[#allocation4 + $0x154] ss:$12 sps:$4 sm:$0xff]   ;;  %v1858_v12 = vld [vmem:[#allocation4 + $0x158] ss:$12 sps:$4 sm:$0xff]   ;;  %v1855_v13 = vld [vmem:[#allocation4 + $0x150] ss:$12 sps:$4 sm:$0xff]  }
  0x51   :  { %v1859_v14 = vld [vmem:[#allocation4 + $0x98] ss:$12 sps:$4 sm:$0xff]   ;;  %v1863_v16 = vld [vmem:[#allocation4 + $0x170] ss:$12 sps:$4 sm:$0xff]   ;;  %v1860_v17 = vld [vmem:[#allocation4 + $0x168] ss:$12 sps:$4 sm:$0xff]  }
  0x52   :  { %297 = vmatpush1.bf16.msra.mxu0 %v1773_v21  ;;  %338 = vmatpush1.bf16.msra.mxu1 %v1797_v35  ;;  %v1862_v15 = vld [vmem:[#allocation4 + $0x16c] ss:$12 sps:$4 sm:$0xff]   ;;  %v1864_v18 = vld [vmem:[#allocation4 + $0xb0] ss:$12 sps:$4 sm:$0xff]   ;;  %v1868_v20 = vld [vmem:[#allocation4 + $0x248] ss:$12 sps:$4 sm:$0xff]   ;;  %v104_v21 = vlaneseq }
  0x53   :  { %298 = vmatprep.subr.bf16.mxu0 %v1774_v24  ;;  %339 = vmatprep.subr.bf16.mxu1 %v1798_v36  ;;  %v1867_v19 = vld [vmem:[#allocation4 + $0x184] ss:$12 sps:$4 sm:$0xff]   ;;  %v2122_v24 = vld [vmem:[%s2154_s2] sm:$0xf] }
  0x54   :  { %v2116_v22 = vshrl.u32 %v104_v21, 7  ;;  %v1908_v21 = vld [vmem:[#allocation4 + $0x258] ss:$12 sps:$4 sm:$0xff]  }
  0x56   :  { %299 = vmatpush1.bf16.msra.mxu0 %v1776_v25  ;;  %340 = vmatpush1.bf16.msra.mxu1 %v1800_v39  ;;  %v106_v23 = vsub.s32 0, %v2116_v22  ;;  %v110_v25 = vsub.s32 1, %v2116_v22  ;;  %v118_v36 = vsub.s32 3, %v2116_v22  ;;  %v1869_v39 = vld [vmem:[#allocation4 + $0x188] ss:$12 sps:$4 sm:$0xff]  }
  0x57   :  { %1031 = vmatprep.subr.bf16.mxu0 %v1803_v29  ;;  %1640 = vmatprep.subr.bf16.mxu1 %v1828_v41  ;;  %v1872_v41 = vld [vmem:[#allocation4 + $0x19c] ss:$12 sps:$4 sm:$0xff]  }
  0x58   :  { %v107_v26 = vrot.slane %v2122_v24, %v106_v23  ;;  %v111_v27 = vrot.slane %v2122_v24, %v110_v25 }
  0x59   :  { %317 = vmatmul.mubr.bf16.vlgmr.msra.gmra.mrb[0].mxu0 %v69_v30  ;;  %358 = vmatmul.mubr.bf16.vlgmr.msra.gmra.mrb[0].mxu1 %v69_v30 }
  0x5a   :  { %1032 = vmatpush1.bf16.msra.mxu0 %v1801_v33  ;;  %1641 = vmatpush3.bf16.msra.mxu1 %v1829_v43  ;;  %v119_v43 = vrot.slane %v2122_v24, %v118_v36  ;;  %v1926_v36 = vld [vmem:[#allocation4 + $0x2e8] ss:$12 sps:$4 sm:$0xff]  }
  0x5b   :  { %1033 = vmatprep.subr.bf16.mxu0 %v1806_v34  ;;  %1642 = vmatprep.subr.bf16.mxu1 %v1833_v45  ;;  %v1874_v45 = vld [vmem:[#allocation4 + $0x1a0] ss:$12 sps:$4 sm:$0xff]  }
  0x5e   :  { %1034 = vmatpush1.bf16.msra.mxu0 %v1804_v37  ;;  %1643 = vmatpush3.bf16.msra.mxu1 %v1834_v48 }
  0x5f   :  { %1035 = vmatprep.subr.bf16.mxu0 %v1809_v38  ;;  %1644 = vmatprep.subr.bf16.mxu1 %v1838_v49  ;;  %v1865_v38 = vld [vmem:[#allocation4 + $0x180] ss:$12 sps:$4 sm:$0xff]  }
  0x62   :  { %1036 = vmatpush1.bf16.msra.mxu0 %v1807_v40  ;;  %1645 = vmatpush3.bf16.msra.mxu1 %v1839_v52  ;;  %v1875_v52 = vld [vmem:[#allocation4 + $0x1b0] ss:$12 sps:$4 sm:$0xff]  }
  0x63   :  { %1037 = vmatprep.subr.bf16.mxu0 %v1812_v42  ;;  %1646 = vmatprep.subr.bf16.mxu1 %v1843_v53  ;;  %v1873_v42 = vld [vmem:[#allocation4 + $0x260] ss:$12 sps:$4 sm:$0xff]   ;;  %v1879_v53 = vld [vmem:[#allocation4 + $0x1b8] ss:$12 sps:$4 sm:$0xff]  }
  0x66   :  { %1038 = vmatpush1.bf16.msra.mxu0 %v1810_v44  ;;  %1647 = vmatpush3.bf16.msra.mxu1 %v1844_v55  ;;  %v1870_v44 = vld [vmem:[#allocation4 + $0x198] ss:$12 sps:$4 sm:$0xff]  }
  0x67   :  { %1039 = vmatprep.subr.bf16.mxu0 %v1815_v46  ;;  %1648 = vmatprep.subr.bf16.mxu1 %v1848_v57  ;;  %v1877_v46 = vld [vmem:[#allocation4 + $0x1b4] ss:$12 sps:$4 sm:$0xff]   ;;  %v1882_v55 = vld [vmem:[#allocation4 + $0x1cc] ss:$12 sps:$4 sm:$0xff]  }
  0x6a   :  { %1040 = vmatpush1.bf16.msra.mxu0 %v1813_v47  ;;  %1649 = vmatpush3.bf16.msra.mxu1 %v1849_v59  ;;  %v1878_v47 = vld [vmem:[#allocation4 + $0x278] ss:$12 sps:$4 sm:$0xff]   ;;  %v1880_v59 = vld [vmem:[#allocation4 + $0x1c8] ss:$12 sps:$4 sm:$0xff]  }
  0x6b   :  { %1041 = vmatprep.subr.bf16.mxu0 %v1818_v50  ;;  %1650 = vmatprep.subr.bf16.mxu1 %v1853_v61  ;;  %v1887_v61 = vld [vmem:[#allocation4 + $0x1e4] ss:$12 sps:$4 sm:$0xff]  }
  0x6e   :  { %1042 = vmatpush1.bf16.msra.mxu0 %v1816_v51  ;;  %1651 = vmatpush3.bf16.msra.mxu1 %v1854_v63  ;;  %v114_v63 = vsub.s32 2, %v2116_v22  ;;  %v1947_v22 = vld [vmem:[#allocation6 + $0x90] sm:$0xff]  }
  0x6f   :  { %1043 = vmatprep.subr.bf16.mxu0 %v1821_v54  ;;  %1652 = vmatprep.subr.bf16.mxu1 %v1858_v12  ;;  %v1902_v12 = vld [vmem:[#allocation4 + $0x22c] ss:$12 sps:$4 sm:$0xff]  }
  0x72   :  { %1044 = vmatpush1.bf16.msra.mxu0 %v1819_v56  ;;  %1653 = vmatpush3.bf16.msra.mxu1 %v1859_v14  ;;  %v1883_v56 = vld [vmem:[#allocation4 + $0x290] ss:$12 sps:$4 sm:$0xff]  }
  0x73   :  { %1045 = vmatprep.subr.bf16.mxu0 %v1824_v58  ;;  %1654 = vmatprep.subr.bf16.mxu1 %v1863_v16  ;;  %v1904_v16 = vld [vmem:[#allocation4 + $0x230] ss:$12 sps:$4 sm:$0xff]  }
  0x76   :  { %1046 = vmatpush1.bf16.msra.mxu0 %v1822_v60  ;;  %1655 = vmatpush3.bf16.msra.mxu1 %v1864_v18  ;;  %v1884_v60 = vld [vmem:[#allocation4 + $0x1d0] ss:$12 sps:$4 sm:$0xff]  }
  0x77   :  { %1047 = vmatprep.subr.bf16.mxu0 %v1827_v62  ;;  %1662 = vmatprep.subr.bf16.mxu1 %v1868_v20  ;;  %v1888_v62 = vld [vmem:[#allocation4 + $0x2a8] ss:$12 sps:$4 sm:$0xff]  }
  0x78   :  { %v1910_v20 = vld [vmem:[#allocation4 + $0x25c] ss:$12 sps:$4 sm:$0xff]  }
  0x7a   :  { %1048 = vmatpush1.bf16.msra.mxu0 %v1825_v0  ;;  %v1885_v0 = vld [vmem:[#allocation4 + $0x1e0] ss:$12 sps:$4 sm:$0xff]  }
  0x7b   :  { %1049 = vmatprep.subr.bf16.mxu0 %v1832_v1  ;;  %v1889_v1 = vld [vmem:[#allocation4 + $0x1e8] ss:$12 sps:$4 sm:$0xff]  }
  0x7e   :  { %1050 = vmatpush1.bf16.msra.mxu0 %v1830_v2  ;;  %v1892_v2 = vld [vmem:[#allocation4 + $0x1fc] ss:$12 sps:$4 sm:$0xff]  }
  0x7f   :  { %1051 = vmatprep.subr.bf16.mxu0 %v1837_v3  ;;  %v1893_v3 = vld [vmem:[#allocation4 + $0x2c0] ss:$12 sps:$4 sm:$0xff]  }
  0x82   :  { %1052 = vmatpush1.bf16.msra.mxu0 %v1835_v4  ;;  %v115_v4 = vrot.slane %v2122_v24, %v114_v63  ;;  %v1913_v24 = vld [vmem:[#allocation4 + $0x274] ss:$12 sps:$4 sm:$0xff]  }
  0x83   :  { %1053 = vmatprep.subr.bf16.mxu0 %v1842_v5  ;;  %v1890_v5 = vld [vmem:[#allocation4 + $0x1f8] ss:$12 sps:$4 sm:$0xff]  }
  0x86   :  { %1054 = vmatpush1.bf16.msra.mxu0 %v1840_v6  ;;  %v1894_v6 = vld [vmem:[#allocation4 + $0x200] ss:$12 sps:$4 sm:$0xff]  }
  0x87   :  { %1055 = vmatprep.subr.bf16.mxu0 %v1847_v7  ;;  %v1897_v7 = vld [vmem:[#allocation4 + $0x214] ss:$12 sps:$4 sm:$0xff]  }
  0x8a   :  { %1056 = vmatpush1.bf16.msra.mxu0 %v1845_v8  ;;  %v1898_v8 = vld [vmem:[#allocation4 + $0x2d8] ss:$12 sps:$4 sm:$0xff]  }
  0x8b   :  { %1057 = vmatprep.subr.bf16.mxu0 %v1852_v9 }
  0x8e   :  { %1058 = vmatpush1.bf16.msra.mxu0 %v1850_v10  ;;  %v1895_v10 = vld [vmem:[#allocation4 + $0x210] ss:$12 sps:$4 sm:$0xff]  }
  0x8f   :  { %1059 = vmatprep.subr.bf16.mxu0 %v1857_v11  ;;  %v1899_v11 = vld [vmem:[#allocation4 + $0x218] ss:$12 sps:$4 sm:$0xff]  }
  0x92   :  { %1060 = vmatpush1.bf16.msra.mxu0 %v1855_v13  ;;  %v1903_v13 = vld [vmem:[#allocation4 + $0x2f0] ss:$12 sps:$4 sm:$0xff]  }
  0x93   :  { %1061 = vmatprep.subr.bf16.mxu0 %v1862_v15  ;;  %v1900_v15 = vld [vmem:[#allocation4 + $0x228] ss:$12 sps:$4 sm:$0xff]  }
  0x96   :  { %1062 = vmatpush1.bf16.msra.mxu0 %v1860_v17  ;;  %v1907_v17 = vld [vmem:[#allocation4 + $0x244] ss:$12 sps:$4 sm:$0xff]  }
  0x97   :  { %1072 = vmatprep.subr.bf16.mxu0 %v1867_v19  ;;  %v1905_v19 = vld [vmem:[#allocation4 + $0x240] ss:$12 sps:$4 sm:$0xff]  }
 0x12c   :  { %v318_v28 = vpop.f32.mrb[0].mxu0  ;;  %v359_v48 = vpop.f32.mrb[0].mxu1 }
 0x12d   :  { %v319_v29 = vadd.f32 %v318_v28, %v107_v26  ;;  %v320_v30 = vpop.f32.mrb[1].mxu0  ;;  %v361_v49 = vpop.f32.mrb[1].mxu1  ;;  %v360_v9 = vadd.f32 %v359_v48, %v115_v4  ;;  %v1911_v26 = vld [vmem:[#allocation4 + $0x270] ss:$12 sps:$4 sm:$0xff]   ;;  %v1914_v28 = vld [vmem:[#allocation4 + $0x288] ss:$12 sps:$4 sm:$0xff]  }
 0x12e   :  { %v321_v31 = vadd.f32 %v320_v30, %v111_v27  ;;  %v322_v32 = vpop.f32.mrb[2].mxu0  ;;  %v362_v50 = vadd.f32 %v361_v49, %v119_v43  ;;  %v363_v51 = vpop.f32.mrb[2].mxu1  ;;  %v1916_v27 = vld [vmem:[#allocation4 + $0x28c] ss:$12 sps:$4 sm:$0xff]   ;;  %v1941_v49 = vld [vmem:[#allocation6 + $0x70] sm:$0xff]  }
 0x12f   :  { %v366_v33 = vmax.f32 %v319_v29, 0.0  ;;  %v323_v34 = vpop.f32.mrb[3].mxu0  ;;  %v364_v54 = vpop.f32.mrb[3].mxu1  ;;  %v368_v14 = vmax.f32 %v360_v9, 0.0  ;;  %v1919_v29 = vld [vmem:[#allocation4 + $0x2a4] ss:$12 sps:$4 sm:$0xff]  }
 0x130   :  { %v367_v35 = vmax.f32 %v321_v31, 0.0  ;;  %v369_v57 = vmax.f32 %v362_v50, 0.0  ;;  %v1917_v30 = vld [vmem:[#allocation4 + $0x2a0] ss:$12 sps:$4 sm:$0xff]   ;;  %v1922_v31 = vld [vmem:[#allocation4 + $0x2bc] ss:$12 sps:$4 sm:$0xff]  }
 0x131   :  { %v370_v40 = vpack.c.bf16 %v366_v33, %v366_v33  ;;  %v372_v18 = vpack.c.bf16 %v368_v14, %v368_v14  ;;  %v1920_v32 = vld [vmem:[#allocation4 + $0x2b8] ss:$12 sps:$4 sm:$0xff]   ;;  %v1925_v33 = vld [vmem:[#allocation4 + $0x2d4] ss:$12 sps:$4 sm:$0xff]   ;;  %v1923_v34 = vld [vmem:[#allocation4 + $0x2d0] ss:$12 sps:$4 sm:$0xff]  }
 0x132   :  { %v371_v37 = vpack.c.bf16 %v367_v35, %v367_v35  ;;  %v373_v58 = vpack.c.bf16 %v369_v57, %v369_v57  ;;  %v1928_v35 = vld [vmem:[#allocation4 + $0x2ec] ss:$12 sps:$4 sm:$0xff]   ;;  %v1942_v50 = vld [vmem:[#allocation6 + $0x30] sm:$0xff]  }
 0x133   :  { %v1935_v43 = vld [vmem:[#allocation6 + $0x58] sm:$0xff]   ;;  %v1940_v48 = vld [vmem:[#allocation6 + $0x28] sm:$0xff]  }
 0x134   :  { %1063 = vmatprep.mubr.bf16.mxu0 %v371_v37  ;;  %1145 = vmatprep.mubr.bf16.mxu1 %v371_v37  ;;  %v1929_v37 = vld [vmem:[#allocation6 + $0x40] sm:$0xff]   ;;  %v1943_v51 = vld [vmem:[#allocation6 + $0x78] sm:$0xff]  }
 0x135   :  { %1064 = vmatmul.mubr.bf16.vlgmr.msra.gmra.mrb[4].mxu0 %v370_v40  ;;  %1146 = vmatmul.mubr.bf16.vlgmr.msra.gmra.mrb[4].mxu1 %v370_v40  ;;  %v1932_v40 = vld [vmem:[#allocation6 + $0x8] sm:$0xff]  }
 0x136   :  { %1073 = vmatpush1.bf16.msra.mxu0 %v1865_v38  ;;  %1663 = vmatpush3.bf16.msra.mxu1 %v1869_v39  ;;  %v1930_v38 = vld [vmem:[#allocation6] sm:$0xff]   ;;  %v1931_v39 = vld [vmem:[#allocation6 + $0x48] sm:$0xff]  }
 0x137   :  { %1074 = vmatprep.subr.bf16.mxu0 %v1872_v41  ;;  %1664 = vmatprep.subr.bf16.mxu1 %v1873_v42  ;;  %v1933_v41 = vld [vmem:[#allocation6 + $0x50] sm:$0xff]  }
 0x138   :  { %1185 = vmatprep.mubr.bf16.mxu1 %v373_v58  ;;  %1104 = vmatprep.mubr.bf16.mxu0 %v373_v58  ;;  %v1934_v42 = vld [vmem:[#allocation6 + $0x10] sm:$0xff]  }
 0x13a   :  { %1075 = vmatpush1.bf16.msra.mxu0 %v1870_v44  ;;  %1665 = vmatpush3.bf16.msra.mxu1 %v1874_v45  ;;  %v1936_v44 = vld [vmem:[#allocation6 + $0x18] sm:$0xff]   ;;  %v1937_v45 = vld [vmem:[#allocation6 + $0x60] sm:$0xff]  }
 0x13b   :  { %1076 = vmatprep.subr.bf16.mxu0 %v1877_v46  ;;  %1666 = vmatprep.subr.bf16.mxu1 %v1878_v47  ;;  %v1938_v46 = vld [vmem:[#allocation6 + $0x20] sm:$0xff]   ;;  %v1939_v47 = vld [vmem:[#allocation6 + $0x68] sm:$0xff]  }
 0x13e   :  { %1077 = vmatpush1.bf16.msra.mxu0 %v1875_v52  ;;  %1667 = vmatpush3.bf16.msra.mxu1 %v1879_v53  ;;  %v1944_v52 = vld [vmem:[#allocation6 + $0x38] sm:$0xff]   ;;  %v2035_v53 = vmov 0.0  }
 0x13f   :  { %1078 = vmatprep.subr.bf16.mxu0 %v1882_v55  ;;  %1668 = vmatprep.subr.bf16.mxu1 %v1883_v56 }
 0x142   :  { %1079 = vmatpush1.bf16.msra.mxu0 %v1880_v59  ;;  %1669 = vmatpush3.bf16.msra.mxu1 %v1884_v60  ;;  %v502_v59 = vld [vmem:[%s2156_s4] sm:$0x7] }
 0x143   :  { %1080 = vmatprep.subr.bf16.mxu0 %v1887_v61  ;;  %1670 = vmatprep.subr.bf16.mxu1 %v1888_v62  ;;  %v515_v60 = vrot.slane %v502_v59, %v114_v63 }
 0x146   :  { %1081 = vmatpush1.bf16.msra.mxu0 %v1885_v0  ;;  %1671 = vmatpush3.bf16.msra.mxu1 %v1889_v1 }
 0x147   :  { %1082 = vmatprep.subr.bf16.mxu0 %v1892_v2  ;;  %1672 = vmatprep.subr.bf16.mxu1 %v1893_v3 }
 0x14a   :  { %1083 = vmatpush1.bf16.msra.mxu0 %v1890_v5  ;;  %1673 = vmatpush3.bf16.msra.mxu1 %v1894_v6  ;;  %v507_v5 = vrot.slane %v502_v59, %v106_v23  ;;  %v511_v6 = vrot.slane %v502_v59, %v110_v25  ;;  %v1948_v23 = vld [vmem:[#allocation6 + $0x98] sm:$0xff]   ;;  %v1949_v25 = vld [vmem:[#allocation6 + $0xa0] sm:$0xff]  }
 0x14b   :  { %1084 = vmatprep.subr.bf16.mxu0 %v1897_v7  ;;  %1674 = vmatprep.subr.bf16.mxu1 %v1898_v8 }
 0x14e   :  { %1085 = vmatpush1.bf16.msra.mxu0 %v1895_v10  ;;  %1675 = vmatpush3.bf16.msra.mxu1 %v1899_v11 }
 0x14f   :  { %1086 = vmatprep.subr.bf16.mxu0 %v1902_v12  ;;  %1676 = vmatprep.subr.bf16.mxu1 %v1903_v13 }
 0x152   :  { %1087 = vmatpush1.bf16.msra.mxu0 %v1900_v15  ;;  %1677 = vmatpush3.bf16.msra.mxu1 %v1904_v16  ;;  %v1945_v15 = vld [vmem:[#allocation6 + $0x80] sm:$0xff]  }
 0x153   :  { %1088 = vmatprep.subr.bf16.mxu0 %v1907_v17  ;;  %1684 = vmatprep.subr.bf16.mxu1 %v1929_v37  ;;  %v1946_v17 = vld [vmem:[#allocation6 + $0x88] sm:$0xff]  }
 0x155   :  { %1186 = vmatmul.mubr.bf16.vlgmr.msra.gmra.mrb[8].mxu1 %v372_v18 }
 0x156   :  { %1089 = vmatpush1.bf16.msra.mxu0 %v1905_v19  ;;  %1685 = vmatpush3.bf16.msra.mxu1 %v1930_v38  ;;  %v1951_v19 = vld [vmem:[#allocation6 + $0xb0] sm:$0xff]  }
 0x157   :  { %1090 = vmatprep.subr.bf16.mxu0 %v1910_v20  ;;  %1686 = vmatprep.subr.bf16.mxu1 %v1931_v39  ;;  %v1952_v20 = vld [vmem:[#allocation6 + $0xb8] sm:$0xff]  }
 0x15a   :  { %1091 = vmatpush1.bf16.msra.mxu0 %v1908_v21  ;;  %1687 = vmatpush3.bf16.msra.mxu1 %v1932_v40 }
 0x15b   :  { %1092 = vmatprep.subr.bf16.mxu0 %v1913_v24  ;;  %1688 = vmatprep.subr.bf16.mxu1 %v1933_v41 }
 0x15e   :  { %1093 = vmatpush1.bf16.msra.mxu0 %v1911_v26  ;;  %1689 = vmatpush3.bf16.msra.mxu1 %v1934_v42 }
 0x15f   :  { %1094 = vmatprep.subr.bf16.mxu0 %v1916_v27  ;;  %1690 = vmatprep.subr.bf16.mxu1 %v1935_v43 }
 0x162   :  { %1095 = vmatpush1.bf16.msra.mxu0 %v1914_v28  ;;  %1691 = vmatpush3.bf16.msra.mxu1 %v1936_v44 }
 0x163   :  { %1096 = vmatprep.subr.bf16.mxu0 %v1919_v29  ;;  %1692 = vmatprep.subr.bf16.mxu1 %v1937_v45 }
 0x166   :  { %1097 = vmatpush1.bf16.msra.mxu0 %v1917_v30  ;;  %1693 = vmatpush3.bf16.msra.mxu1 %v1938_v46 }
 0x167   :  { %1098 = vmatprep.subr.bf16.mxu0 %v1922_v31  ;;  %1694 = vmatprep.subr.bf16.mxu1 %v1939_v47  ;;  %v1615_v31 = vld [vmem:[%s2158_s6] ss:$0 sm:$0xff] }
 0x16a   :  { %1099 = vmatpush1.bf16.msra.mxu0 %v1920_v32  ;;  %1695 = vmatpush3.bf16.msra.mxu1 %v1940_v48 }
 0x16b   :  { %1100 = vmatprep.subr.bf16.mxu0 %v1925_v33  ;;  %1696 = vmatprep.subr.bf16.mxu1 %v1941_v49 }
 0x16e   :  { %1101 = vmatpush1.bf16.msra.mxu0 %v1923_v34  ;;  %1697 = vmatpush3.bf16.msra.mxu1 %v1942_v50 }
 0x16f   :  { %1102 = vmatprep.subr.bf16.mxu0 %v1928_v35  ;;  %1698 = vmatprep.subr.bf16.mxu1 %v1943_v51 }
 0x172   :  { %1103 = vmatpush1.bf16.msra.mxu0 %v1926_v36  ;;  %1699 = vmatpush3.bf16.msra.mxu1 %v1944_v52 }
 0x173   :  { %1715 = vmatprep.subr.bf16.mxu1 %v2035_v53 }
 0x175   :  { %1105 = vmatmul.mubr.bf16.vlgmr.msra.gmra.mrb[4].mxu0 %v372_v18  ;;  %v1950_v18 = vld [vmem:[#allocation6 + $0xa8] sm:$0xff]  }
 0x208   :  { %v1656_v54 = vpop.f32.mrb[4].mxu1 }
 0x209   :  { %v1657_v55 = vpop.f32.mrb[5].mxu1 }
 0x20a   :  { %v1658_v56 = vadd.f32 %v1657_v55, %v1656_v54  ;;  %v1659_v57 = vpop.f32.mrb[6].mxu1 }
 0x20b   :  { %v1660_v58 = vpop.f32.mrb[7].mxu1 }
 0x20c   :  { %v1148_v0 = vadd.f32 %v1658_v56, %v515_v60 }
 0x228   :  { %v1678_v61 = vpop.f32.mrb[8].mxu1 }
 0x229   :  { %v1679_v62 = vpop.f32.mrb[9].mxu1 }
 0x22a   :  { %v1680_v1 = vadd.f32 %v1679_v62, %v1678_v61  ;;  %v1681_v2 = vpop.f32.mrb[10].mxu1 }
 0x22b   :  { %v1682_v3 = vpop.f32.mrb[11].mxu1 }
 0x22c   :  { %v1188_v4 = vadd.f32 %v1680_v1, %v1148_v0 }
 0x22e   :  { %v1195_v21 = vmax.f32 %v1188_v4, 0.0 }
 0x230   :  { %v1198_v24 = vpack.c.bf16 %v1195_v21, %v1195_v21 }
 0x248   :  { %v1106_v7 = vpop.f32.mrb[4].mxu0 }
 0x249   :  { %v1735_v8 = vadd.f32 %v1106_v7, %v507_v5  ;;  %v1108_v9 = vpop.f32.mrb[5].mxu0 }
 0x24a   :  { %v1736_v10 = vadd.f32 %v1108_v9, %v511_v6  ;;  %v1110_v11 = vpop.f32.mrb[6].mxu0 }
 0x24b   :  { %v1193_v12 = vmax.f32 %v1735_v8, 0.0  ;;  %v1111_v63 = vpop.f32.mrb[7].mxu0 }
 0x24c   :  { %v1194_v13 = vmax.f32 %v1736_v10, 0.0 }
 0x24d   :  { %v1196_v16 = vpack.c.bf16 %v1193_v12, %v1193_v12 }
 0x24e   :  { %v1197_v14 = vpack.c.bf16 %v1194_v13, %v1194_v13 }
 0x250   :  { %1430 = vmatprep.mubr.bf16.mxu1 %v1197_v14 }
 0x251   :  { %1431 = vmatmul.mubr.bf16.vlgmr.msra.gmra.mrb[12].mxu1 %v1196_v16 }
 0x252   :  { %1716 = vmatpush3.bf16.msra.mxu1 %v1945_v15  ;;  %1731 = vmatprep.mubr.msk.bf16.mxu1 %vm2036_vm0, %v2035_v53 }
 0x253   :  { %1717 = vmatprep.subr.bf16.mxu1 %v2035_v53 }
 0x256   :  { %1718 = vmatpush3.bf16.msra.mxu1 %v1946_v17 }
 0x257   :  { %1719 = vmatprep.subr.bf16.mxu1 %v2035_v53 }
 0x25a   :  { %1720 = vmatpush3.bf16.msra.mxu1 %v1947_v22 }
 0x25b   :  { %1721 = vmatprep.subr.bf16.mxu1 %v2035_v53 }
 0x25e   :  { %1722 = vmatpush3.bf16.msra.mxu1 %v1948_v23 }
 0x25f   :  { %1723 = vmatprep.subr.bf16.mxu1 %v2035_v53 }
 0x262   :  { %1724 = vmatpush3.bf16.msra.mxu1 %v1949_v25 }
 0x263   :  { %1725 = vmatprep.subr.bf16.mxu1 %v2035_v53 }
 0x266   :  { %1726 = vmatpush3.bf16.msra.mxu1 %v1950_v18 }
 0x267   :  { %1727 = vmatprep.subr.bf16.mxu1 %v2035_v53 }
 0x26a   :  { %1728 = vmatpush3.bf16.msra.mxu1 %v1951_v19 }
 0x26b   :  { %1729 = vmatprep.subr.bf16.mxu1 %v2035_v53 }
 0x26e   :  { %1730 = vmatpush3.bf16.msra.mxu1 %v1952_v20 }
 0x271   :  { %1732 = vmatmul.mubr.bf16.vlgmr.msra.gmra.mrb[16].mxu1 %v1198_v24 }
 0x324   :  { %v1700_v26 = vpop.f32.mrb[12].mxu1 }
 0x325   :  { %v1701_v27 = vpop.f32.mrb[13].mxu1 }
 0x326   :  { %v1702_v28 = vadd.f32 %v1701_v27, %v1700_v26  ;;  %v1703_v29 = vpop.f32.mrb[14].mxu1 }
 0x327   :  { %v1704_v30 = vpop.f32.mrb[15].mxu1 }
 0x328   :  { %v1433_v32 = vadd.f32 %v1702_v28, %v1615_v31 }
 0x344   :  { %v1472_v33 = vpop.f32.mrb[16].mxu1 }
 0x345   :  { %v1473_v34 = vadd.f32 %v1472_v33, %v1433_v32  ;;  %v1733_v35 = vpop.f32.mrb[17].mxu1 }
 0x346   :  { %v1475_v36 = vpop.f32.mrb[18].mxu1 }
 0x347   :  { %1953 = vtanh.f32 %v1473_v34  ;;  %v1734_v37 = vpop.f32.mrb[19].mxu1 }
 0x351   :  { %v1954_v38 = vpop.eup %1953 }
 0x352   :  { %v1479_v39 = vmul.f32 2.0, %v1954_v38 }
 0x354   :  { %1480 = vst [vmem:[%s2159_s7] sm:$0xff] %v1479_v39 }
 0x355   :  { %1485 = vsyncpa [#allocation3], 1 }
 0x356   :  { %1486 = vsyncpa [#allocation5], 1 }

</bundles_post_ra>
